<compile_context>
chip_gen: v5e
topology: v5e:2x2
jax: 0.10.0
libtpu: 0.0.40
codegen_flags: <defaults>
</compile_context>

<pallas_src>
import math

import jax
import jax.numpy as jnp
from jax.experimental import pallas as pl
from jax.experimental.pallas import tpu as pltpu


def _negation_kernel(logic_ref, out_ref):
    # Elementwise exact reciprocal (matches torch's `1.0 / logic`).
    out_ref[...] = (1.0 / logic_ref[...]).astype(out_ref.dtype)


def _vmem_capacity_bytes() -> int:
    try:
        return int(pltpu.get_tpu_info().vmem_capacity_bytes)
    except Exception:
        return 64 << 20  # conservative: v7x per-TC VMEM


def _choose_width(n: int) -> int:
    # Lane-dense slab width: large multiple of 128, preferably dividing n
    # exactly so no padding copy is needed.
    for w in (2048, 1024, 512, 256, 128):
        if n % w == 0:
            return w
    return 512 if n >= 512 else 128


def negation_forward(logic: jax.Array, *, max_tile_bytes: int | None = None) -> jax.Array:
    """Pallas TPU implementation of Negation.forward: elementwise 1.0 / logic."""
    orig_shape = logic.shape
    dtype = logic.dtype
    n = math.prod(orig_shape) if orig_shape else 1
    if n == 0:
        return logic  # nothing to compute for empty arrays

    itemsize = jnp.dtype(dtype).itemsize
    vmem_cap = _vmem_capacity_bytes()
    if max_tile_bytes is None:
        # Room for in+out double buffering plus compiler scratch:
        # ~8 MiB tiles on v7x (64 MiB VMEM), ~18 MiB on v5e/v6e (128 MiB).
        max_tile_bytes = max(4 << 20, min(24 << 20, (vmem_cap - (16 << 20)) // 6))

    # Flatten to a wide, lane-dense [rows, W] slab (independent of input layout).
    flat = logic.reshape(-1)
    w = _choose_width(n)
    n_pad = pl.cdiv(n, w) * w
    if n_pad != n:
        flat = jnp.pad(flat, (0, n_pad - n), constant_values=1)
    rows = n_pad // w
    x2d = flat.reshape(rows, w)

    # Packed-sublane row granule: 8 rows for 4-byte, 16 for 2-byte, 32 for 1-byte.
    granule = 8 * max(1, 4 // itemsize)
    row_bytes = w * itemsize

    def _round_up(v: int, m: int) -> int:
        return ((v + m - 1) // m) * m

    if rows <= granule:
        # Single full-extent block (block dims equal array dims -> no masking).
        tile_r = rows
    else:
        rows_g = _round_up(rows, granule)
        # Largest granule-multiple row count that fits the per-tile byte budget.
        max_r_by_bytes = max(granule, (max_tile_bytes // row_bytes) // granule * granule)
        # Keep >= 2 parallel grid steps when possible (v7x has 2 TensorCores).
        half_rows = _round_up(pl.cdiv(rows, 2), granule)
        tile_r = min(max_r_by_bytes, rows_g, half_rows)

    num_blocks = pl.cdiv(rows, tile_r)
    tile_bytes = tile_r * row_bytes
    # input + output, double-buffered, plus headroom; stay below physical VMEM.
    vmem_limit = int(max(16 << 20, min(4 * tile_bytes + (4 << 20), vmem_cap - (8 << 20))))

    spec = pl.BlockSpec((tile_r, w), lambda i: (i, 0))
    out2d = pl.pallas_call(
        _negation_kernel,
        out_shape=jax.ShapeDtypeStruct((rows, w), dtype),
        grid=(num_blocks,),
        in_specs=[spec],
        out_specs=spec,
        compiler_params=pltpu.CompilerParams(
            dimension_semantics=("parallel",),
            vmem_limit_bytes=vmem_limit,
        ),
    )(x2d)

    out_flat = out2d.reshape(-1)
    if n_pad != n:
        out_flat = out_flat[:n]
    return out_flat.reshape(orig_shape)


if __name__ == "__main__":
    key = jax.random.PRNGKey(0)
    k1, k2, k3 = jax.random.split(key, 3)

    # Primary shape consistent with the module's elementwise forward on
    # probability-like logic vectors: [batch=16, hidden=256], values away from 0.
    logic = jax.random.uniform(k1, (16, 256), dtype=jnp.float32, minval=0.5, maxval=1.5)
    out = jax.block_until_ready(negation_forward(logic))
    assert out.shape == logic.shape and out.dtype == logic.dtype
    assert jnp.allclose(out, 1.0 / logic, rtol=1e-6, atol=1e-6), "mismatch (primary path)"

    # Multi-step grid path: small per-tile budget forces >= 2 parallel blocks.
    logic2 = jax.random.uniform(k2, (128, 256), dtype=jnp.float32, minval=0.5, maxval=1.5)
    out2 = jax.block_until_ready(negation_forward(logic2, max_tile_bytes=64 * 1024))
    assert jnp.allclose(out2, 1.0 / logic2, rtol=1e-6, atol=1e-6), "mismatch (grid path)"

    # Awkward shape (rank 3, odd sizes, narrow last dim) -> padded lane-dense slab.
    logic3 = jax.random.uniform(k3, (3, 5, 7), dtype=jnp.float32, minval=0.5, maxval=1.5)
    out3 = jax.block_until_ready(negation_forward(logic3))
    assert out3.shape == logic3.shape and out3.dtype == logic3.dtype
    assert jnp.allclose(out3, 1.0 / logic3, rtol=1e-6, atol=1e-6), "mismatch (padded path)"

    print("KERNEL_OK")
</pallas_src>

<mosaic_0001>
module attributes {stable_mosaic.version = 11 : i64} {
  func.func @_negation_kernel(%arg0: i32, %arg1: memref<2x2048xf32, #tpu.memory_space<vmem>>, %arg2: memref<2x2048xf32, #tpu.memory_space<vmem>>) attributes {dimension_semantics = [#tpu.dimension_semantics<parallel>], iteration_bounds = array<i64: 1>, scalar_prefetch = 0 : i64, scratch_operands = 0 : i64, tpu.core_type = #tpu.core_type<tc>, window_params = [{transform_indices = @transform_0, window_bounds = array<i64: 2, 2048>}, {transform_indices = @transform_1, window_bounds = array<i64: 2, 2048>}]} {
    %c0 = arith.constant 0 : index
    %c0_0 = arith.constant 0 : index
    %0 = vector.load %arg1[%c0, %c0_0] : memref<2x2048xf32, #tpu.memory_space<vmem>>, vector<2x2048xf32>
    %cst = arith.constant 1.000000e+00 : f32
    %1 = vector.broadcast %cst : f32 to vector<2x2048xf32>
    %2 = arith.divf %1, %0 : vector<2x2048xf32>
    %c0_1 = arith.constant 0 : index
    %c0_2 = arith.constant 0 : index
    %3 = vector.load %arg2[%c0_1, %c0_2] : memref<2x2048xf32, #tpu.memory_space<vmem>>, vector<2x2048xf32>
    tpu.vector_store %arg2[%c0_1, %c0_2], %2 {strides = array<i32>} : memref<2x2048xf32, #tpu.memory_space<vmem>>, vector<2x2048xf32>,
    return
  }
  func.func @transform_0(%arg0: i32) -> (i32, i32) {
    %c0_i32 = arith.constant 0 : i32
    %c0_i32_0 = arith.constant 0 : i32
    return %arg0, %c0_i32 : i32, i32
  }
  func.func @transform_1(%arg0: i32) -> (i32, i32) {
    %c0_i32 = arith.constant 0 : i32
    %c0_i32_0 = arith.constant 0 : i32
    return %arg0, %c0_i32 : i32, i32
  }
}

</mosaic_0001>

<bundles_post_ra>
// kernel: tpu_custom_call.1
= control target key start
LH: loop header
LB: loop body
LE: loop exit
PB: predicated region body
PF: predicated region fallthrough
CT: control target
= control target key end

     0   :  { %6 = vsyncpa [#allocation3], 0  ;;  %s222_s0 = inlined_call_operand.hbm [shape: f32[2,2048], index: 0, kind: input, shape index: {}]   ;;  %s223_s1 = inlined_call_operand.hbm [shape: f32[2,2048], index: 1, kind: output, shape index: {}]  }
   0x1   :  { %7 = vsyncpa [#allocation4], 0  ;;  %s13_s8 = sshll.u32 %s222_s0, 4  ;;  %s170_s9 = smov [#allocation2]   ;;  %s14_s8 = int_to_ptr.hbm [resolvable:$true] %s13_s8 }
   0x2   :  { %s15_s10 = sshll.u32 %s170_s9, 4  ;;  %s16_s10 = int_to_ptr.vmem [resolvable:$true] %s15_s10 }
   0x3   :  { %18 = dma.hbm_to_vmem [thread:$0]  %s14_s8, 512, %s16_s10, [#allocation3]  }
   0x4   :  { %166 = dma.done.wait [#allocation3], 512  }
   0x5   :  { %167 = vsyncadd [#allocation3], 4294966784  ;;  %v23_v0 = vld [vmem:[#allocation2] sm:$0xff]  ;;  %v24_v1 = vld [vmem:[#allocation2 + $0x8] sm:$0xff]  ;;  %s171_s0 = smov [#allocation5]   ;;  %s98_s14 = sshll.u32 %s223_s1, 4  ;;  %s99_s14 = int_to_ptr.hbm [resolvable:$true] %s98_s14 }
   0x6   :  { %v25_v2 = vld [vmem:[#allocation2 + $0x10] sm:$0xff]  ;;  %110 = vrcp.f32 %v23_v0  ;;  %v26_v3 = vld [vmem:[#allocation2 + $0x18] sm:$0xff]  ;;  %v36_v4 = vand.u32 2147483647, %v23_v0  ;;  %v38_v5 = vand.u32 2147483648, %v23_v0  ;;  %v53_v6 = vand.u32 2147483648, %v24_v1 }
   0x7   :  { %112 = vrcp.f32 %v24_v1  ;;  %vm32_vm0 = vweird.f32 %v23_v0  ;;  %vm47_vm1 = vweird.f32 %v24_v1  ;;  %v51_v10 = vand.u32 2147483647, %v24_v1  ;;  %s96_s11 = sshll.u32 %s171_s0, 4  ;;  %s97_s11 = int_to_ptr.vmem [resolvable:$true] %s96_s11 }
   0x8   :  { %114 = vrcp.f32 %v25_v2  ;;  %vm185_vm2 = vcmp.eq.f32.partialorder %v36_v4, 8.507059e+37  ;;  %v39_v13 = vor.u32 1.1754944e-38, %v38_v5  ;;  %vm62_vm3 = vweird.f32 %v25_v2 }
   0x9   :  { %116 = vrcp.f32 %v26_v3  ;;  %v54_v16 = vor.u32 1.1754944e-38, %v53_v6  ;;  %v66_v20 = vand.u32 2147483647, %v25_v2  ;;  %v68_v21 = vand.u32 2147483648, %v25_v2 }
   0xa   :  { %vm77_vm8 = vweird.f32 %v26_v3  ;;  %v81_v27 = vand.u32 2147483647, %v26_v3  ;;  %v83_v28 = vand.u32 2147483648, %v26_v3  ;;  %vm52_vm11 = vcmp.eq.f32.partialorder %v51_v10, 8.507059e+37 }
   0xb   :  { %v69_v35 = vor.u32 1.1754944e-38, %v68_v21  ;;  %vm67_vm13 = vcmp.eq.f32.partialorder %v66_v20, 8.507059e+37 }
   0xc   :  { %v111_v7 = vpop.eup %110  ;;  %v84_v42 = vor.u32 1.1754944e-38, %v83_v28  ;;  %vm82_vm15 = vcmp.eq.f32.partialorder %v81_v27, 8.507059e+37 }
   0xd   :  { %v113_v8 = vpop.eup %112  ;;  %v28_v9 = vmul.f32 %v111_v7, %v23_v0  ;;  %vm33_vm4 = vweird.f32 %v111_v7 }
   0xe   :  { %v115_v11 = vpop.eup %114  ;;  %v43_v14 = vmul.f32 %v113_v8, %v24_v1  ;;  %vm48_vm5 = vweird.f32 %v113_v8  ;;  %vm190_vm7 = vmor %vm32_vm0, %vm33_vm4 }
   0xf   :  { %v29_v15 = vsub.f32 1.0, %v28_v9  ;;  %v58_v17 = vmul.f32 %v115_v11, %v25_v2  ;;  %v117_v18 = vpop.eup %116  ;;  %vm63_vm6 = vweird.f32 %v115_v11  ;;  %vm195_vm9 = vmor %vm47_vm1, %vm48_vm5 }
  0x10   :  { %v44_v19 = vsub.f32 1.0, %v43_v14  ;;  %v73_v24 = vmul.f32 %v117_v18, %v26_v3  ;;  %vm78_vm10 = vweird.f32 %v117_v18  ;;  %vm200_vm12 = vmor %vm62_vm3, %vm63_vm6 }
  0x11   :  { %v30_v22 = vmul.f32 %v111_v7, %v29_v15  ;;  %v59_v23 = vsub.f32 1.0, %v58_v17  ;;  %vm211_vm14 = vmor %vm77_vm8, %vm78_vm10 }
  0x12   :  { %v45_v26 = vmul.f32 %v113_v8, %v44_v19  ;;  %v74_v32 = vsub.f32 1.0, %v73_v24 }
  0x13   :  { %v31_v29 = vadd.f32 %v111_v7, %v30_v22  ;;  %v60_v31 = vmul.f32 %v115_v11, %v59_v23 }
  0x14   :  { %v46_v33 = vadd.f32 %v113_v8, %v45_v26  ;;  %v75_v38 = vmul.f32 %v117_v18, %v74_v32 }
  0x15   :  { %v35_v36 = vsel %vm190_vm7, %v111_v7, %v31_v29  ;;  %v61_v37 = vadd.f32 %v115_v11, %v60_v31 }
  0x16   :  { %v40_v39 = vsel %vm185_vm2, %v39_v13, %v35_v36  ;;  %v50_v40 = vsel %vm195_vm9, %v113_v8, %v46_v33  ;;  %v76_v45 = vadd.f32 %v117_v18, %v75_v38 }
  0x17   :  { %87 = vst [vmem:[#allocation5] sm:$0xff] %v40_v39  ;;  %v55_v43 = vsel %vm52_vm11, %v54_v16, %v50_v40  ;;  %v65_v44 = vsel %vm200_vm12, %v115_v11, %v61_v37 }
  0x18   :  { %88 = vst [vmem:[#allocation5 + $0x8] sm:$0xff] %v55_v43  ;;  %v70_v46 = vsel %vm67_vm13, %v69_v35, %v65_v44  ;;  %v80_v47 = vsel %vm211_vm14, %v117_v18, %v76_v45 }
  0x19   :  { %89 = vst [vmem:[#allocation5 + $0x10] sm:$0xff] %v70_v46  ;;  %v85_v48 = vsel %vm82_vm15, %v84_v42, %v80_v47 }
  0x1a   :  { %90 = vst [vmem:[#allocation5 + $0x18] sm:$0xff] %v85_v48 }
  0x1b   :  { %101 = dma.vmem_to_hbm [thread:$0]  %s97_s11, 512, %s99_s14, [#allocation4]  }
  0x1c   :  { %168 = dma.done.wait [#allocation4], 512  }
  0x1d   :  { %169 = vsyncadd [#allocation4], 4294966784 }
  0x1e   :  { %106 = vsyncpa [#allocation3], 1 }
  0x1f   :  { %107 = vsyncpa [#allocation4], 1 }

</bundles_post_ra>
